<compile_context>
chip_gen: v6e
topology: v6e:2x2x1
jax: 0.10.0
libtpu: 0.0.40
codegen_flags: <defaults>
</compile_context>

<pallas_src>
import math

import jax
import jax.numpy as jnp
import numpy as np
from jax import lax
from jax.experimental import pallas as pl
from jax.experimental.pallas import tpu as pltpu


def _round_up(x, m):
    return ((x + m - 1) // m) * m


def _modconv_kernel(cond_ref, bias_ref, w_ref, cols_ref, o_ref):
    """One (batch, column-tile) step of the modulated conv as an MXU matmul.

    cond_ref: (1, 1, Kd)    scale * condition expanded to im2col rows (this batch)
    bias_ref: (1, C_out, 1) per-batch bias (repeat_interleave semantics of the spec)
    w_ref:    (C_out, Kd)   batch-independent base weight in im2col layout
    cols_ref: (Kd, tn)      im2col'ed input columns for this tile (lane-dense)
    o_ref:    (C_out, tn)   lane-dense output tile
    """
    # Modulate the small weight tile once per grid step (VPU work = C_out*Kd only);
    # the big operands (cols, weight) stay batch-independent / shared.
    w_mod = w_ref[...] * cond_ref[0]                              # (C_out, Kd)
    acc = jnp.dot(w_mod, cols_ref[...],
                  preferred_element_type=jnp.float32)             # MXU: (C_out, tn)
    # NOTE: casting w_mod / cols to bf16 here would roughly double MXU throughput
    # on v6e/v7x at reduced precision; kept f32 to preserve module numerics.
    o_ref[...] = (acc + bias_ref[0]).astype(o_ref.dtype)


def base_conv2d(x, weight, bias, condition_feature, *, stride=1, padding=0):
    """Pallas implementation of BaseConv2d.forward.

    x:                 (B, C_in, H, W)       float32
    weight:            (C_out, C_in, K, K)   float32
    bias:              (C_out,) or None      float32
    condition_feature: (B, 1, C_in, 1, 1)    float32
    returns:           (B, C_out, OH, OW)
    """
    B, C_in, H, W = x.shape
    C_out, _, K, _ = weight.shape
    scale = 1.0 / math.sqrt(C_in * K * K)

    OH = (H + 2 * padding - K) // stride + 1
    OW = (W + 2 * padding - K) // stride + 1
    Kd = C_in * K * K
    Npb = OH * OW

    # ---- layout plumbing (wrapper-side): pad + im2col so the kernel sees one
    # lane-dense matmul instead of B*K*K tiny matmuls with a C_in contraction. ----
    x_pad = jnp.pad(x, ((0, 0), (0, 0), (padding, padding), (padding, padding)))
    taps = []
    for kh in range(K):
        for kw in range(K):
            taps.append(lax.slice(
                x_pad,
                (0, 0, kh, kw),
                (B, C_in, kh + (OH - 1) * stride + 1, kw + (OW - 1) * stride + 1),
                (1, 1, stride, stride)))                      # (B, C_in, OH, OW)
    cols = jnp.stack(taps, axis=2)                            # (B, C_in, K*K, OH, OW)
    cols = cols.transpose(1, 2, 0, 3, 4).reshape(Kd, B, Npb)  # row = c*K*K + kh*K + kw

    # Lane-dense N tiling: tile width multiple of 128, per-batch columns zero-padded.
    tn = min(1024, _round_up(Npb, 128))
    Npb_pad = _round_up(Npb, tn)
    nj = Npb_pad // tn
    if Npb_pad != Npb:
        cols = jnp.pad(cols, ((0, 0), (0, 0), (0, Npb_pad - Npb)))
    cols = cols.reshape(Kd, B * Npb_pad)

    # Batch-independent weight in im2col layout (last dims no longer (K, K)).
    w2d = weight.reshape(C_out, Kd)

    # scale * condition expanded to the im2col row ordering; applied in-kernel.
    cond = condition_feature.reshape(B, C_in)
    cond_rows = jnp.repeat(cond * scale, K * K, axis=1).reshape(B, 1, Kd)

    # Faithful to the PyTorch forward: torch.repeat_interleave(bias, b) is attached
    # to the flat grouped-conv channel axis (b*C_out) and then .view(b, C_out, ...),
    # which yields bias_eff[b, o] = bias[(b*C_out + o) // b] (interleaved pattern).
    if bias is None:
        bias_eff = jnp.zeros((B, C_out), jnp.float32)
    else:
        bias_eff = jnp.repeat(bias, B).reshape(B, C_out)
    bias3 = bias_eff[:, :, None]                              # (B, C_out, 1)

    # Explicit VMEM budget: double-buffered cols/out tiles + weight + per-batch vecs.
    need = 4 * (2 * Kd * tn + 2 * C_out * tn + 2 * C_out * Kd + 2 * (Kd + C_out))
    vmem_limit = int(min(48 * 2**20, max(4 * 2**20, 2 * need)))

    out2d = pl.pallas_call(
        _modconv_kernel,
        out_shape=jax.ShapeDtypeStruct((C_out, B * Npb_pad), x.dtype),
        grid_spec=pltpu.PrefetchScalarGridSpec(
            num_scalar_prefetch=0,
            grid=(B, nj),
            in_specs=[
                pl.BlockSpec((1, 1, Kd), lambda b, j: (b, 0, 0)),       # cond rows
                pl.BlockSpec((1, C_out, 1), lambda b, j: (b, 0, 0)),    # per-batch bias
                pl.BlockSpec((C_out, Kd), lambda b, j: (0, 0)),         # shared weight
                pl.BlockSpec((Kd, tn), lambda b, j: (0, b * nj + j)),   # cols tile
            ],
            out_specs=pl.BlockSpec((C_out, tn), lambda b, j: (0, b * nj + j)),
        ),
        compiler_params=pltpu.CompilerParams(
            dimension_semantics=("parallel", "parallel"),
            vmem_limit_bytes=vmem_limit),
    )(cond_rows, bias3, w2d, cols)

    out = out2d.reshape(C_out, B, Npb_pad)[:, :, :Npb]
    out = out.reshape(C_out, B, OH, OW).transpose(1, 0, 2, 3)
    return out


def _reference(x, weight, bias, condition_feature, *, stride, padding):
    B, C_in, H, W = x.shape
    C_out, _, K, _ = weight.shape
    scale = 1.0 / math.sqrt(C_in * K * K)
    w_mod = weight[None] * scale * condition_feature.reshape(B, 1, C_in, 1, 1)
    outs = []
    for i in range(B):
        o = lax.conv_general_dilated(
            x[i:i + 1], w_mod[i],
            window_strides=(stride, stride),
            padding=[(padding, padding), (padding, padding)],
            dimension_numbers=("NCHW", "OIHW", "NCHW"),
            precision=lax.Precision.HIGHEST)
        outs.append(o)
    out = jnp.concatenate(outs, axis=0)
    if bias is None:
        bias_eff = jnp.zeros((B, C_out), jnp.float32)
    else:
        bias_eff = jnp.repeat(bias, B).reshape(B, C_out)
    return out + bias_eff[:, :, None, None]


if __name__ == "__main__":
    key = jax.random.PRNGKey(0)
    k_x, k_w, k_b, k_c = jax.random.split(key, 4)

    B, C_in, C_out, H, W, K = 2, 4, 8, 16, 16, 3
    x = jax.random.normal(k_x, (B, C_in, H, W), jnp.float32)
    weight = jax.random.normal(k_w, (C_out, C_in, K, K), jnp.float32)   # torch.randn
    bias = 0.1 * jax.random.normal(k_b, (C_out,), jnp.float32)          # nonzero: exercises bias path
    condition_feature = jax.random.normal(k_c, (B, 1, C_in, 1, 1), jnp.float32)

    for stride, padding in ((1, 1), (2, 1)):
        out = base_conv2d(x, weight, bias, condition_feature,
                          stride=stride, padding=padding)
        out = jax.block_until_ready(out)
        ref = _reference(x, weight, bias, condition_feature,
                         stride=stride, padding=padding)
        np.testing.assert_allclose(np.asarray(out), np.asarray(ref),
                                   rtol=2e-4, atol=2e-4)

    print("KERNEL_OK")
</pallas_src>

<mosaic_0001>
module attributes {stable_mosaic.version = 11 : i64} {
  func.func @_modconv_kernel(%arg0: i32, %arg1: i32, %arg2: memref<1x1x36xf32, #tpu.memory_space<vmem>>, %arg3: memref<1x8x1xf32, #tpu.memory_space<vmem>>, %arg4: memref<8x36xf32, #tpu.memory_space<vmem>>, %arg5: memref<36x256xf32, #tpu.memory_space<vmem>>, %arg6: memref<8x256xf32, #tpu.memory_space<vmem>>) attributes {dimension_semantics = [#tpu.dimension_semantics<parallel>, #tpu.dimension_semantics<parallel>], iteration_bounds = array<i64: 2, 1>, scalar_prefetch = 0 : i64, scratch_operands = 0 : i64, tpu.core_type = #tpu.core_type<tc>, window_params = [{transform_indices = @transform_0, window_bounds = array<i64: 1, 1, 36>}, {transform_indices = @transform_1, window_bounds = array<i64: 1, 8, 1>}, {pipeline_mode = #tpu.pipeline_mode<synchronous>, transform_indices = @transform_2, window_bounds = array<i64: 8, 36>}, {transform_indices = @transform_3, window_bounds = array<i64: 36, 256>}, {transform_indices = @transform_4, window_bounds = array<i64: 8, 256>}]} {
    %c0 = arith.constant 0 : index
    %c0_0 = arith.constant 0 : index
    %0 = vector.load %arg4[%c0, %c0_0] : memref<8x36xf32, #tpu.memory_space<vmem>>, vector<8x36xf32>
    %c0_1 = arith.constant 0 : index
    %c0_2 = arith.constant 0 : index
    %c0_3 = arith.constant 0 : index
    %1 = vector.load %arg2[%c0_1, %c0_2, %c0_3] : memref<1x1x36xf32, #tpu.memory_space<vmem>>, vector<1x1x36xf32>
    %2 = vector.shape_cast %1 : vector<1x1x36xf32> to vector<1x36xf32>
    %3 = vector.broadcast %2 : vector<1x36xf32> to vector<8x36xf32>
    %4 = arith.mulf %0, %3 : vector<8x36xf32>
    %c0_4 = arith.constant 0 : index
    %c0_5 = arith.constant 0 : index
    %5 = vector.load %arg5[%c0_4, %c0_5] : memref<36x256xf32, #tpu.memory_space<vmem>>, vector<36x256xf32>
    %cst = arith.constant dense<0.000000e+00> : vector<8x256xf32>
    %6 = tpu.matmul %4, %5, %cst {dimension_numbers = #tpu.dot_dimension_numbers<[1], [0], [0], [1], [0, 0, 1, 1], [], []>} : vector<8x36xf32>, vector<36x256xf32>, vector<8x256xf32> -> vector<8x256xf32>
    %c0_6 = arith.constant 0 : index
    %c0_7 = arith.constant 0 : index
    %c0_8 = arith.constant 0 : index
    %7 = vector.load %arg3[%c0_6, %c0_7, %c0_8] : memref<1x8x1xf32, #tpu.memory_space<vmem>>, vector<1x8x1xf32>
    %8 = vector.shape_cast %7 : vector<1x8x1xf32> to vector<8x1xf32>
    %9 = vector.broadcast %8 : vector<8x1xf32> to vector<8x256xf32>
    %10 = arith.addf %6, %9 : vector<8x256xf32>
    %c0_9 = arith.constant 0 : index
    %c0_10 = arith.constant 0 : index
    %11 = vector.load %arg6[%c0_9, %c0_10] : memref<8x256xf32, #tpu.memory_space<vmem>>, vector<8x256xf32>
    tpu.vector_store %arg6[%c0_9, %c0_10], %10 {strides = array<i32>} : memref<8x256xf32, #tpu.memory_space<vmem>>, vector<8x256xf32>,
    return
  }
  func.func @transform_0(%arg0: i32, %arg1: i32) -> (i32, i32, i32) {
    %c0_i32 = arith.constant 0 : i32
    %c0_i32_0 = arith.constant 0 : i32
    %c0_i32_1 = arith.constant 0 : i32
    return %arg0, %c0_i32, %c0_i32_0 : i32, i32, i32
  }
  func.func @transform_1(%arg0: i32, %arg1: i32) -> (i32, i32, i32) {
    %c0_i32 = arith.constant 0 : i32
    %c0_i32_0 = arith.constant 0 : i32
    %c0_i32_1 = arith.constant 0 : i32
    return %arg0, %c0_i32, %c0_i32_0 : i32, i32, i32
  }
  func.func @transform_2(%arg0: i32, %arg1: i32) -> (i32, i32) {
    %c0_i32 = arith.constant 0 : i32
    %c0_i32_0 = arith.constant 0 : i32
    %c0_i32_1 = arith.constant 0 : i32
    return %c0_i32, %c0_i32_0 : i32, i32
  }
  func.func @transform_3(%arg0: i32, %arg1: i32) -> (i32, i32) {
    %c1_i32 = arith.constant 1 : i32
    %0 = arith.muli %arg0, %c1_i32 : i32
    %1 = arith.addi %0, %arg1 : i32
    %c0_i32 = arith.constant 0 : i32
    %c0_i32_0 = arith.constant 0 : i32
    return %c0_i32, %1 : i32, i32
  }
  func.func @transform_4(%arg0: i32, %arg1: i32) -> (i32, i32) {
    %c1_i32 = arith.constant 1 : i32
    %0 = arith.muli %arg0, %c1_i32 : i32
    %1 = arith.addi %0, %arg1 : i32
    %c0_i32 = arith.constant 0 : i32
    %c0_i32_0 = arith.constant 0 : i32
    return %c0_i32, %1 : i32, i32
  }
}

</mosaic_0001>

<bundles_post_ra>
// kernel: tpu_custom_call.1
= control target key start
LH: loop header
LB: loop body
LE: loop exit
PB: predicated region body
PF: predicated region fallthrough
CT: control target
= control target key end

     0   :  { %9 = vsyncpa [#allocation3], 0  ;;  %s880_s0 = inlined_call_operand.vmem [shape: f32[2,1,36], index: 0, kind: input, shape index: {}]   ;;  %s881_s1 = inlined_call_operand.vmem [shape: f32[2,8,1], index: 1, kind: input, shape index: {}]   ;;  %s882_s2 = inlined_call_operand.vmem [shape: f32[8,36], index: 2, kind: input, shape index: {}]   ;;  %s883_s3 = inlined_call_operand.hbm [shape: f32[36,512], index: 3, kind: input, shape index: {}]   ;;  %s884_s4 = inlined_call_operand.hbm [shape: f32[8,512], index: 4, kind: output, shape index: {}]  }
   0x1   :  { %11 = vsyncpa [#allocation3 + $0x1], 0 }
   0x2   :  { %12 = vsyncpa [#allocation4], 0 }
   0x3   :  { %14 = vsyncpa [#allocation4 + $0x1], 0  ;;  %s726_s15 = smov 0   ;;  %s728_s16 = smov 0  }
   0x4   :  { %s730_s17 = smov 0   ;;  %s732_s18 = smov 0  }
   0x5   :  { %s734_s19 = smov 0   ;;  %s736_s20 = smov 0  }
   0x6 LB: > { %s494_s21 = sadd.s32 4294967295, %s692_s20   ;;  %s495_s22 = sadd.s32 4294967294, %s692_s20   ;;  %s692_s20 = sphi %s736_s20, %s20_s20   ;;  %s688_s19 = sphi %s734_s19, %s895_s19   ;;  %s684_s18 = sphi %s732_s18, %s894_s18   ;;  %s680_s17 = sphi %s730_s17, %s893_s17   ;;  %s676_s16 = sphi %s728_s16, %s892_s16   ;;  %s672_s15 = sphi %s726_s15, %s891_s15  }
   0x7   : > { %s32_s23 = sadd.s32 1, %s688_s19  ;;  %s114_s24 = sadd.s32 1, %s680_s17 }
   0x8   : > { %p34_p0 = scmp.ge.s32.totalorder %s32_s23, 2  ;;  %p121_p1 = scmp.ne.s32.totalorder %s680_s17, %s676_s16 }
   0x9   : > { %p122_p2 = scmp.eq.s32.totalorder %s692_s20, 0  ;;  %p127_p3 = scmp.ne.s32.totalorder %s676_s16, %s672_s15 }
   0xa   : > { %s897_s23 = smov (%p34_p0, %s32_s23), 0  ;;  %p128_p5 = scmp.eq.s32.totalorder %s494_s21, 0 }
   0xb   : > { %p767_p4 = por %p122_p2, %p121_p1  ;;  %s111_s26 = ssub.s32 %s688_s19, %s897_s23 }
   0xc   : > { %p153_p6 = scmp.eq.s32.totalorder %s494_s21, 1  ;;  %p112_p7 = scmp.eq.s32.totalorder %s111_s26, 0 }
   0xd   : > { %p773_p8 = por %p128_p5, %p127_p3  ;;  %p159_p10 = scmp.eq.s32.totalorder %s495_s22, 1 }
   0xe   : > { %p777_p9 = por %p153_p6, %p121_p1  ;;  %p528_p13 = scmp.lt.s32.totalorder %s692_s20, 2 }
   0xf   : > { %s782_s29 = scalar_select %p112_p7, %s680_s17, %s114_s24  }
  0x10   : > { %p784_p11 = por %p159_p10, %p127_p3  ;;  %s195_s5 = sand.u32 1, %s680_s17  }
  0x11   : > { %s514_s6 = smul.u32 80, %s195_s5  ;;  %s512_s7 = sshll.u32 %s688_s19, 8 }
  0x12   : > { %p794_p0 = pnand %p528_p13, %p767_p4  ;;  %s206_s11 = scalar_lea.hbm %s883_s3, %s512_s7 }
  0x13   : > { %s199_s12 = scalar_lea.vmem [#allocation2], %s514_s6  ;;  %s196_s14 = scalar_lea.sflag [#allocation3], %s195_s5 }
  0x14   : > { %s207_s13 = sshll.u32 %s199_s12, 4  ;;  %p586_p1 = pneg %p794_p0  ;;  %s208_s13 = int_to_ptr.vmem [resolvable:$true] %s207_s13 }
  0x15   : > { %s597_s21 = scalar_lea.vmem %s208_s13, 1280  ;;  %s694_s22 = smov [#allocation2]  }
  0x16   : > { %p598_p2 = scmp.ne.s32.totalorder %s208_s13, %s597_s21  ;;  %s602_s24 = sshll.u32 %s694_s22, 4  ;;  %s603_s24 = int_to_ptr.vmem [resolvable:$false] %s602_s24 }
  0x17   : > { %s604_s25 = scalar_lea.vmem %s603_s24, 2560  ;;  %p605_p4 = scmp.lt.s32.totalorder %s208_s13, %s603_s24 }
  0x18   : > { %p600_p3 = pnand %p598_p2, %p586_p1  ;;  %p606_p6 = scmp.lt.s32.totalorder %s604_s25, %s597_s21 }
  0x1a   : > { %p601_p5 = pneg %p600_p3  ;;  %p607_p7 = por %p606_p6, %p605_p4 }
  0x1c   : > { %p608_p10 = pnand %p607_p7, %p601_p5 }
  0x1e   : > { %611 = shalt.err (!%p608_p10)
}
  0x1f   : > { %s695_s26 = smov 512   ;;  %s696_s5 = smov 256  }
  0x20   : > { %s697_s6 = smov 16   ;;  %p500_p13 = scmp.ge.s32.totalorder %s692_s20, 1 }
  0x21   : > { %523 = dma.hbm_to_vmem [thread:$0]  (!%p794_p0), %s206_s11, 1280, %s208_s13, %s196_s14, %s695_s26, %s696_s5, %s697_s6  }
  0x22   : > { %p215_p1 = scmp.lt.s32.totalorder %s692_s20, 3 }
  0x24   : > { %p216_p2 = pnand %p500_p13, %p215_p1 }
  0x25   : > { %s808_s7 = sand.u32 (!%p216_p2), 1, %s676_s16  }
  0x26   : > { %219 = sbr.rel (%p216_p2) target bundleno = 266 (0x10a), region = 36  ;;  %s222_s10 = scalar_lea.sflag (!%p216_p2), [#allocation3], %s808_s7 }
  0x27   : > { %s515_s9 = smul.u32 (!%p216_p2), 80, %s808_s7 }
  0x29   : > { %s812_s12 = scalar_lea.vmem (!%p216_p2), [#allocation2], %s515_s9 }
  0x2b   : > { %663 = dma.done.wait (%p773_p8), %s222_s10, 1280  }
  0x2c   : > { %665 = vsyncadd (%p773_p8), %s222_s10, 4294966016  ;;  %p257_p0 = scmp.lt.s32.totalorder %s684_s18, 1  ;;  %v698_v0 = vmov 0.0   ;;  %v699_v1 = vmov 0   ;;  %vm297_vm0 = vcmask 1043456   ;;  %v284_v4 = vld [vmem:[%s812_s12 + $0x38] sm:$0xff] }
  0x2d   : > { %368 = vmatprep.mubr.f32.mxu0 %v698_v0  ;;  %583 = vset.pattern.permute.xlu0 %v699_v1  ;;  %v286_v2 = vld [vmem:[%s812_s12 + $0x48] sm:$0xf]  ;;  %v285_v3 = vld [vmem:[%s812_s12 + $0x40] sm:$0xf]  ;;  %v283_v5 = vld [vmem:[%s812_s12 + $0x30] sm:$0xff]  ;;  %vm293_vm1 = vcmask 293888  }
  0x2e   : > { %s258_s8 = scalar_select %p257_p0, %s684_s18, 1  ;;  %504 = vmatprep.subr.msk.mxu0 %vm297_vm0, %v286_v2  ;;  %v282_v6 = vld [vmem:[%s812_s12 + $0x28] sm:$0xff]  ;;  %v281_v7 = vld [vmem:[%s812_s12 + $0x20] sm:$0xff]  ;;  %v280_v8 = vld [vmem:[%s812_s12 + $0x18] sm:$0xff] }
  0x2f   : > { %505 = vmatpush1.msk.msra.mxu0 %vm297_vm0, %v285_v3  ;;  %v268_v9 = vld [vmem:[%s882_s2] sm:$0xff]  ;;  %v278_v13 = vld [vmem:[%s812_s12 + $0x8] sm:$0xff]  ;;  %s501_s5 = sshll.u32 %s808_s7, 4  ;;  %s513_s6 = sshll.u32 %s684_s18, 8 }
  0x30   : > { %s502_s11 = sshll.u32 %s258_s8, 3  ;;  %s259_s14 = scalar_lea.vmem %s880_s0, %s258_s8  ;;  %328 = vmatprep.subr.mxu0 %v284_v4  ;;  %v279_v12 = vld [vmem:[%s812_s12 + $0x10] sm:$0xff]  ;;  %v277_v14 = vld [vmem:[%s812_s12] sm:$0xff] }
  0x31   : > { %s263_s24 = scalar_lea.vmem %s881_s1, %s502_s11  ;;  %329 = vmatpush1.msra.mxu0 %v283_v5  ;;  %v503_v10 = vld [vmem:[%s259_s14] ss:$0 sm:$0xff]  ;;  %s256_s9 = scalar_lea.vmem [#allocation5], %s501_s5 }
  0x32   : > { %v287_v11 = vld [vmem:[%s263_s24] sm:$0xff]  ;;  %330 = vmatprep.subr.mxu0 %v282_v6  ;;  %v276_v15 = vmul.f32 %v503_v10, %v268_v9  ;;  %s393_s10 = sshll.u32 %s256_s9, 4  ;;  %s391_s11 = scalar_lea.hbm %s884_s4, %s513_s6  ;;  %s394_s10 = int_to_ptr.vmem [resolvable:$true] %s393_s10 }
  0x33   : > { %290 = vperm.xlu0 %583, %v287_v11   ;;  %331 = vmatpush1.msra.mxu0 %v281_v7  ;;  %s378_s27 = scalar_lea.sflag [#allocation4], %s808_s7  ;;  %s612_s13 = scalar_lea.vmem %s394_s10, 256 }
  0x34   : > { %332 = vmatprep.subr.mxu0 %v280_v8  ;;  %p613_p8 = scmp.ne.s32.totalorder %s394_s10, %s612_s13  ;;  %s700_s14 = smov [#allocation5]  }
  0x35   : > { %333 = vmatpush1.msra.mxu0 %v279_v12  ;;  %s616_s18 = sshll.u32 %s700_s14, 4  ;;  %s617_s18 = int_to_ptr.vmem [resolvable:$false] %s616_s18 }
  0x36   : > { %334 = vmatprep.subr.mxu0 %v278_v13  ;;  %p614_p3 = pnand %p613_p8, %p777_p9  ;;  %s618_s21 = scalar_lea.vmem %s617_s18, 512 }
  0x37   : > { %335 = vmatpush1.msra.mxu0 %v277_v14  ;;  %p619_p4 = scmp.lt.s32.totalorder %s394_s10, %s617_s18  ;;  %p620_p6 = scmp.lt.s32.totalorder %s618_s21, %s612_s13 }
  0x38   : > { %506 = vmatmul.mubr.msk.f32.vlgmr.msra.gmra.mxu0 %vm293_vm1, %v276_v15  ;;  %p615_p5 = pneg %p614_p3 }
  0x39   : > { %p621_p7 = por %p620_p6, %p619_p4 }
  0x3b   : > { %p622_p10 = pnand %p621_p7, %p615_p5 }
  0xae   : > { %v291_v16 = vpop.permute.xlu0 %290 }
  0xf8   : > { %v370_v17 = vpop.f32.mrf.mxu0 }
  0xf9   : > { %v371_v18 = vadd.f32 %v370_v17, %v291_v16 }
  0xfa   : > { %v372_v19 = vpop.f32.mrf.mxu0 }
  0xfb   : > { %375 = vst [vmem:[%s256_s9] sm:$0xff] %v371_v18  ;;  %v373_v20 = vadd.f32 %v372_v19, %v291_v16 }
  0xfd   : > { %376 = vst [vmem:[%s256_s9 + $0x8] sm:$0xff] %v373_v20 }
  0xfe   : > { %625 = shalt.err (!%p622_p10)
}
  0xff   : > { %s626_s22 = scalar_lea.hbm %s391_s11, 256  ;;  %s630_s25 = scalar_lea.hbm %s884_s4, 512 }
 0x100   : > { %p627_p13 = scmp.ne.s32.totalorder %s391_s11, %s626_s22  ;;  %p631_p0 = scmp.lt.s32.totalorder %s391_s11, %s884_s4 }
 0x101   : > { %p632_p8 = scmp.lt.s32.totalorder %s630_s25, %s626_s22 }
 0x102   : > { %p628_p1 = pnand %p627_p13, %p777_p9 }
 0x103   : > { %p633_p3 = por %p632_p8, %p631_p0 }
 0x104   : > { %p629_p2 = pneg %p628_p1 }
 0x106   : > { %p634_p12 = pnand %p633_p3, %p629_p2 }
 0x108   : > { %637 = shalt.err (!%p634_p12)
}
 0x109   : > { %518 = dma.vmem_to_hbm [thread:$0]  (%p777_p9), %s394_s10, 256, %s391_s11, %s378_s27  }
 0x10a PF: > { %s405_s6 = sand.u32 1, %s672_s15   ;;  %p890_p5 = scmp.ge.s32.totalorder %s692_s20, 2 }
 0x10b   : > { %s406_s9 = scalar_lea.sflag [#allocation4], %s405_s6 }
 0x10c   : > { %p525_p4 = pnand %p890_p5, %p784_p11 }
 0x10e   : > { %p526_p6 = pneg %p525_p4 }
 0x110   : > { %667 = dma.done.wait (%p526_p6), %s406_s9, 256  }
 0x111   : > { %669 = vsyncadd (%p526_p6), %s406_s9, 4294967040  ;;  %s20_s20 = sadd.s32 1, %s692_s20   ;;  %s891_s15 = smov %s676_s16 }
 0x112   : > { %p17_p7 = scmp.ge.s32.totalorder %s20_s20, 4   ;;  %s892_s16 = smov %s680_s17 }
 0x113   : > { %s893_s17 = smov %s782_s29  ;;  %s894_s18 = smov %s688_s19 }
 0x114   : > { %s895_s19 = smov %s897_s23  ;;  %19 = sbr.rel (!%p17_p7) target bundleno = 6 (0x6), region = 87 }
 0x119   :  { %411 = vsyncpa [#allocation3], 1 }
 0x11a   :  { %413 = vsyncpa [#allocation3 + $0x1], 1 }
 0x11b   :  { %414 = vsyncpa [#allocation4], 1 }
 0x11c   :  { %416 = vsyncpa [#allocation4 + $0x1], 1 }

</bundles_post_ra>
